<compile_context>
chip_gen: v6e
topology: v6e:2x2x1
jax: 0.10.0
libtpu: 0.0.40
codegen_flags: <defaults>
</compile_context>

<pallas_src>
import functools

import jax
import jax.numpy as jnp
from jax.experimental import pallas as pl
from jax.experimental.pallas import tpu as pltpu

_LANE = 128
_SUBTILE = 8  # sublanes of one 32-bit vreg tile


def _recall_kernel(pr_ref, gt_ref, out_ref, *, rows_total):
    """Accumulate per-lane match counts for one parallel chunk of the grid."""
    p = pl.program_id(0)           # parallel chunk (megacore / v7x 2-TC split)
    k = pl.program_id(1)           # sequential reduction step within the chunk
    k_steps = pl.num_programs(1)
    blk = p * k_steps + k          # UNCLAMPED global block id (drives the mask)

    block_rows, lanes = pr_ref.shape

    @pl.when(k == 0)
    def _init():
        out_ref[...] = jnp.zeros_like(out_ref)

    def _fold(eq_i32):
        # (block_rows,128) -> (8,128): chain of elementwise vreg adds (pure
        # VPU, no cross-lane work in the hot loop). int32 keeps counts exact.
        # TODO(synk): verify via pl.lower_as_mlir that eq/reshape stay fused
        # (no materialized VMEM temp); if not, restructure as a fori_loop over
        # (8,128) sub-chunks.
        return jnp.sum(
            eq_i32.reshape(block_rows // _SUBTILE, _SUBTILE, lanes), axis=0)

    is_full = (blk + 1) * block_rows <= rows_total

    @pl.when(is_full)
    def _fast():
        # Fully valid block: no mask math at all (the hot path).
        eq = (pr_ref[...] == gt_ref[...]).astype(jnp.int32)
        out_ref[...] += _fold(eq)

    @pl.when(jnp.logical_not(is_full))
    def _slow():
        # Last (partial) block of a chunk, or a clamped overflow step: mask by
        # row index against the remaining valid rows (<= 0 => all-false mask,
        # so overflow steps contribute nothing even though they re-read data).
        row_idx = jax.lax.broadcasted_iota(jnp.int32, (block_rows, lanes), 0)
        valid = row_idx < (rows_total - blk * block_rows)
        eq = (valid & (pr_ref[...] == gt_ref[...])).astype(jnp.int32)
        out_ref[...] += _fold(eq)


def _common_dtype(a, b):
    """Narrowest dtype that can represent both inputs (kernel is HBM-bound)."""
    dt = jnp.promote_types(a.dtype, b.dtype)
    if dt == jnp.bool_:
        return jnp.int8
    if jnp.issubdtype(dt, jnp.integer):
        return dt if jnp.dtype(dt).itemsize <= 4 else jnp.int32
    if jnp.issubdtype(dt, jnp.floating):
        return dt if jnp.dtype(dt).itemsize <= 4 else jnp.float32
    return jnp.int32


def recall_weighted(y_pr, y_gt):
    """Weighted recall over labels present in y_pr ∪ y_gt (== accuracy)."""
    assert y_pr.shape == y_gt.shape
    n = int(y_pr.size)
    if n == 0:
        # sklearn would warn / apply zero_division; we return 0.0 explicitly.
        return jnp.float32(0.0)

    dt = _common_dtype(y_pr, y_gt)
    pr = jnp.ravel(y_pr).astype(dt)
    gt = jnp.ravel(y_gt).astype(dt)

    itemsize = jnp.dtype(dt).itemsize
    sub_mult = max(_SUBTILE, 32 // itemsize)   # min sublane tile: 8/16/32
    chunk = sub_mult * _LANE

    # Only the aligned prefix goes through the kernel (its reshape is free);
    # the small (< sub_mult*128 element) tail is folded in with plain jnp so
    # no full-array pad copy is ever materialized.
    rows_main = (n // chunk) * sub_mult
    n_main = rows_main * _LANE

    count = jnp.int32(0)

    if rows_main > 0:
        if n_main == n:
            pr_main, gt_main = pr, gt
        else:
            pr_main, gt_main = pr[:n_main], gt[:n_main]
        pr2 = pr_main.reshape(rows_main, _LANE)
        gt2 = gt_main.reshape(rows_main, _LANE)

        # ~4 MiB per input per pipeline buffer (2 inputs x 2 buffers = 16 MiB)
        # amortizes the ~0.35 us/step grid overhead; fits v6e/v7x default
        # scoped VMEM and v5e once vmem_limit_bytes is raised below.
        target_rows = max(sub_mult, (4 << 20) // (_LANE * itemsize))
        block_rows = min(target_rows, rows_main)

        nb = pl.cdiv(rows_main, block_rows)   # total row-blocks
        p_chunks = 2 if nb >= 2 else 1        # split across the 2 TCs on v7x
        k_steps = pl.cdiv(nb, p_chunks)

        def in_map(p, k):
            # Clamp so overflow (p, k) steps re-read the last block; the
            # in-kernel mask (using the UNCLAMPED blk) zeroes their result.
            return (jnp.minimum(p * k_steps + k, nb - 1), 0)

        kernel = functools.partial(_recall_kernel, rows_total=rows_main)

        out_bytes = p_chunks * _SUBTILE * _LANE * 4
        partials = pl.pallas_call(
            kernel,
            out_shape=jax.ShapeDtypeStruct(
                (p_chunks * _SUBTILE, _LANE), jnp.int32),
            grid_spec=pltpu.PrefetchScalarGridSpec(
                num_scalar_prefetch=0,
                grid=(p_chunks, k_steps),
                in_specs=[
                    pl.BlockSpec((block_rows, _LANE), in_map),
                    pl.BlockSpec((block_rows, _LANE), in_map),
                ],
                out_specs=pl.BlockSpec((_SUBTILE, _LANE), lambda p, k: (p, 0)),
            ),
            compiler_params=pltpu.CompilerParams(
                dimension_semantics=("parallel", "arbitrary"),
                vmem_limit_bytes=48 << 20,
            ),
            cost_estimate=pl.CostEstimate(
                flops=n_main,
                transcendentals=0,
                bytes_accessed=2 * n_main * itemsize + out_bytes,
            ),
        )(pr2, gt2)

        count = count + jnp.sum(partials)

    if n_main < n:
        # Tiny tail: < sub_mult*128 elements, handled with plain jnp.
        count = count + jnp.sum((pr[n_main:] == gt[n_main:]).astype(jnp.int32))

    return count.astype(jnp.float32) / jnp.float32(n)


if __name__ == "__main__":
    key = jax.random.PRNGKey(0)
    k_pr, k_gt, k_pr2, k_gt2 = jax.random.split(key, 4)

    # Segmentation-style integer label maps: batch=2, 32x32 spatial, 4 classes.
    y_gt = jax.random.randint(k_gt, (2, 32, 32), 0, 4, dtype=jnp.int32)
    y_pr = jax.random.randint(k_pr, (2, 32, 32), 0, 4, dtype=jnp.int32)

    result = recall_weighted(y_pr, y_gt)
    result = jax.block_until_ready(result)
    ref = jnp.mean((y_pr == y_gt).astype(jnp.float32))
    assert abs(float(result) - float(ref)) < 1e-6, (float(result), float(ref))

    # Misaligned size (n not a multiple of 128): kernel prefix + jnp tail path.
    y_gt2 = jax.random.randint(k_gt2, (5, 50, 50), 0, 4, dtype=jnp.int32)
    y_pr2 = jax.random.randint(k_pr2, (5, 50, 50), 0, 4, dtype=jnp.int32)
    result2 = jax.block_until_ready(recall_weighted(y_pr2, y_gt2))
    ref2 = jnp.mean((y_pr2 == y_gt2).astype(jnp.float32))
    assert abs(float(result2) - float(ref2)) < 1e-6, (float(result2), float(ref2))

    print("KERNEL_OK")
</pallas_src>

<mosaic_0001>
module attributes {stable_mosaic.version = 11 : i64} {
  func.func @_recall_kernel(%arg0: i32, %arg1: i32, %arg2: memref<16x128xi32, #tpu.memory_space<vmem>>, %arg3: memref<16x128xi32, #tpu.memory_space<vmem>>, %arg4: memref<8x128xi32, #tpu.memory_space<vmem>>) attributes {dimension_semantics = [#tpu.dimension_semantics<parallel>, #tpu.dimension_semantics<arbitrary>], iteration_bounds = array<i64: 1, 1>, scalar_prefetch = 0 : i64, scratch_operands = 0 : i64, tpu.core_type = #tpu.core_type<tc>, window_params = [{transform_indices = @transform_0, window_bounds = array<i64: 16, 128>}, {transform_indices = @transform_1, window_bounds = array<i64: 16, 128>}, {transform_indices = @transform_2, window_bounds = array<i64: 8, 128>}]} {
    %c1_i32 = arith.constant 1 : i32
    %0 = arith.muli %arg0, %c1_i32 : i32
    %1 = arith.addi %0, %arg1 : i32
    %c0_i32 = arith.constant 0 : i32
    %2 = arith.cmpi eq, %arg1, %c0_i32 : i32
    %3 = arith.extui %2 : i1 to i32
    %c0_i32_0 = arith.constant 0 : i32
    %4 = arith.cmpi ne, %3, %c0_i32_0 : i32
    scf.if %4 {
      %c0_i32_5 = arith.constant 0 : i32
      %13 = vector.broadcast %c0_i32_5 : i32 to vector<8x128xi32>
      %c0 = arith.constant 0 : index
      %c0_6 = arith.constant 0 : index
      %14 = vector.load %arg4[%c0, %c0_6] : memref<8x128xi32, #tpu.memory_space<vmem>>, vector<8x128xi32>
      tpu.vector_store %arg4[%c0, %c0_6], %13 {strides = array<i32>} : memref<8x128xi32, #tpu.memory_space<vmem>>, vector<8x128xi32>,
    } else {
    }
    %c1_i32_1 = arith.constant 1 : i32
    %5 = arith.addi %1, %c1_i32_1 : i32
    %c16_i32 = arith.constant 16 : i32
    %6 = arith.muli %5, %c16_i32 : i32
    %c16_i32_2 = arith.constant 16 : i32
    %7 = arith.cmpi sle, %6, %c16_i32_2 : i32
    %8 = arith.extui %7 : i1 to i32
    %c0_i32_3 = arith.constant 0 : i32
    %9 = arith.cmpi ne, %8, %c0_i32_3 : i32
    scf.if %9 {
      %c0 = arith.constant 0 : index
      %c0_5 = arith.constant 0 : index
      %13 = vector.load %arg2[%c0, %c0_5] : memref<16x128xi32, #tpu.memory_space<vmem>>, vector<16x128xi32>
      %c0_6 = arith.constant 0 : index
      %c0_7 = arith.constant 0 : index
      %14 = vector.load %arg3[%c0_6, %c0_7] : memref<16x128xi32, #tpu.memory_space<vmem>>, vector<16x128xi32>
      %15 = arith.cmpi eq, %13, %14 : vector<16x128xi32>
      %16 = arith.extui %15 : vector<16x128xi1> to vector<16x128xi32>
      %c0_8 = arith.constant 0 : index
      %c0_9 = arith.constant 0 : index
      %17 = vector.load %arg4[%c0_8, %c0_9] : memref<8x128xi32, #tpu.memory_space<vmem>>, vector<8x128xi32>
      %18 = vector.shape_cast %16 : vector<16x128xi32> to vector<2x8x128xi32>
      %cst = arith.constant dense<0> : vector<8x128xi32>
      %19 = vector.multi_reduction <add>, %18, %cst [0] : vector<2x8x128xi32> to vector<8x128xi32>
      %20 = arith.addi %17, %19 : vector<8x128xi32>
      %c0_10 = arith.constant 0 : index
      %c0_11 = arith.constant 0 : index
      %21 = vector.load %arg4[%c0_10, %c0_11] : memref<8x128xi32, #tpu.memory_space<vmem>>, vector<8x128xi32>
      tpu.vector_store %arg4[%c0_10, %c0_11], %20 {strides = array<i32>} : memref<8x128xi32, #tpu.memory_space<vmem>>, vector<8x128xi32>,
    } else {
    }
    %true = arith.constant true
    %10 = arith.xori %7, %true : i1
    %11 = arith.extui %10 : i1 to i32
    %c0_i32_4 = arith.constant 0 : i32
    %12 = arith.cmpi ne, %11, %c0_i32_4 : i32
    scf.if %12 {
      %13 = tpu.iota {dimensions = array<i32: 0>} : vector<16x128xi32>
      %c16_i32_5 = arith.constant 16 : i32
      %14 = arith.muli %1, %c16_i32_5 : i32
      %c16_i32_6 = arith.constant 16 : i32
      %15 = arith.subi %c16_i32_6, %14 : i32
      %16 = vector.broadcast %15 : i32 to vector<16x128xi32>
      %17 = arith.cmpi slt, %13, %16 : vector<16x128xi32>
      %c0 = arith.constant 0 : index
      %c0_7 = arith.constant 0 : index
      %18 = vector.load %arg2[%c0, %c0_7] : memref<16x128xi32, #tpu.memory_space<vmem>>, vector<16x128xi32>
      %c0_8 = arith.constant 0 : index
      %c0_9 = arith.constant 0 : index
      %19 = vector.load %arg3[%c0_8, %c0_9] : memref<16x128xi32, #tpu.memory_space<vmem>>, vector<16x128xi32>
      %20 = arith.cmpi eq, %18, %19 : vector<16x128xi32>
      %21 = arith.andi %17, %20 : vector<16x128xi1>
      %22 = arith.extui %21 : vector<16x128xi1> to vector<16x128xi32>
      %c0_10 = arith.constant 0 : index
      %c0_11 = arith.constant 0 : index
      %23 = vector.load %arg4[%c0_10, %c0_11] : memref<8x128xi32, #tpu.memory_space<vmem>>, vector<8x128xi32>
      %24 = vector.shape_cast %22 : vector<16x128xi32> to vector<2x8x128xi32>
      %cst = arith.constant dense<0> : vector<8x128xi32>
      %25 = vector.multi_reduction <add>, %24, %cst [0] : vector<2x8x128xi32> to vector<8x128xi32>
      %26 = arith.addi %23, %25 : vector<8x128xi32>
      %c0_12 = arith.constant 0 : index
      %c0_13 = arith.constant 0 : index
      %27 = vector.load %arg4[%c0_12, %c0_13] : memref<8x128xi32, #tpu.memory_space<vmem>>, vector<8x128xi32>
      tpu.vector_store %arg4[%c0_12, %c0_13], %26 {strides = array<i32>} : memref<8x128xi32, #tpu.memory_space<vmem>>, vector<8x128xi32>,
    } else {
    }
    return
  }
  func.func @transform_0(%arg0: i32, %arg1: i32) -> (i32, i32) {
    %c1_i32 = arith.constant 1 : i32
    %0 = arith.muli %arg0, %c1_i32 : i32
    %1 = arith.addi %0, %arg1 : i32
    %c0_i32 = arith.constant 0 : i32
    %2 = arith.minsi %1, %c0_i32 : i32
    %c0_i32_0 = arith.constant 0 : i32
    %c0_i32_1 = arith.constant 0 : i32
    return %2, %c0_i32_0 : i32, i32
  }
  func.func @transform_1(%arg0: i32, %arg1: i32) -> (i32, i32) {
    %c1_i32 = arith.constant 1 : i32
    %0 = arith.muli %arg0, %c1_i32 : i32
    %1 = arith.addi %0, %arg1 : i32
    %c0_i32 = arith.constant 0 : i32
    %2 = arith.minsi %1, %c0_i32 : i32
    %c0_i32_0 = arith.constant 0 : i32
    %c0_i32_1 = arith.constant 0 : i32
    return %2, %c0_i32_0 : i32, i32
  }
  func.func @transform_2(%arg0: i32, %arg1: i32) -> (i32, i32) {
    %c0_i32 = arith.constant 0 : i32
    %c0_i32_0 = arith.constant 0 : i32
    return %arg0, %c0_i32 : i32, i32
  }
}

</mosaic_0001>

<bundles_post_ra>
// kernel: tpu_custom_call.1
= control target key start
LH: loop header
LB: loop body
LE: loop exit
PB: predicated region body
PF: predicated region fallthrough
CT: control target
= control target key end

     0   :  { %7 = vsyncpa [#allocation3], 0  ;;  %s232_s0 = inlined_call_operand.hbm [shape: s32[16,128], index: 0, kind: input, shape index: {}]   ;;  %s233_s1 = inlined_call_operand.hbm [shape: s32[16,128], index: 1, kind: input, shape index: {}]   ;;  %s234_s2 = inlined_call_operand.hbm [shape: s32[8,128], index: 2, kind: output, shape index: {}]  }
   0x1   :  { %8 = vsyncpa [#allocation6], 0 }
   0x2   :  { %9 = vsyncpa [#allocation4], 0  ;;  %s202_s9 = smov [#allocation2]  }
   0x3   :  { %s21_s10 = sshll.u32 %s202_s9, 4  ;;  %s22_s10 = int_to_ptr.vmem [resolvable:$true] %s21_s10 }
   0x4   :  { %s144_s11 = scalar_lea.vmem %s22_s10, 256  ;;  %p149_p1 = scmp.lt.s32.totalorder %s22_s10, %s22_s10 }
   0x5   :  { %p145_p0 = scmp.ne.s32.totalorder %s22_s10, %s144_s11  ;;  %p150_p2 = scmp.lt.s32.totalorder %s144_s11, %s144_s11 }
   0x7   :  { %p151_p3 = por %p150_p2, %p149_p1 }
   0x9   :  { %p152_p4 = pnand %p151_p3, %p145_p0 }
   0xb   :  { %155 = shalt.err (!%p152_p4)
}
   0xc   :  { %s203_s12 = smov 128   ;;  %s204_s13 = smov 8  }
   0xd   :  { %27 = dma.hbm_to_vmem [thread:$0]  %s232_s0, 256, %s22_s10, [#allocation3], %s203_s12, %s203_s12, %s204_s13  }
   0xe   :  { %s205_s16 = smov [#allocation5]  }
   0xf   :  { %s39_s17 = sshll.u32 %s205_s16, 4  ;;  %s40_s17 = int_to_ptr.vmem [resolvable:$true] %s39_s17 }
  0x10   :  { %s164_s18 = scalar_lea.vmem %s40_s17, 256  ;;  %p169_p6 = scmp.lt.s32.totalorder %s40_s17, %s40_s17 }
  0x11   :  { %p165_p5 = scmp.ne.s32.totalorder %s40_s17, %s164_s18  ;;  %p170_p7 = scmp.lt.s32.totalorder %s164_s18, %s164_s18 }
  0x13   :  { %p171_p8 = por %p170_p7, %p169_p6 }
  0x15   :  { %p172_p9 = pnand %p171_p8, %p165_p5 }
  0x17   :  { %175 = shalt.err (!%p172_p9)
}
  0x18   :  { %45 = dma.hbm_to_vmem [thread:$0]  %s233_s1, 256, %s40_s17, [#allocation6], %s203_s12, %s203_s12, %s204_s13  }
  0x19   :  { %196 = dma.done.wait [#allocation3], 256  }
  0x1a   :  { %197 = vsyncadd [#allocation3], 4294967040 }
  0x1b   :  { %198 = dma.done.wait [#allocation6], 256  }
  0x1c   :  { %199 = vsyncadd [#allocation6], 4294967040  ;;  %v72_v0 = vld [vmem:[#allocation2] sm:$0xff]  ;;  %v73_v1 = vld [vmem:[#allocation2 + $0x8] sm:$0xff]  ;;  %v206_v4 = vmov 0   ;;  %s207_s0 = smov [#allocation7]  }
  0x1d   :  { %v74_v2 = vld [vmem:[#allocation5] sm:$0xff]  ;;  %v75_v3 = vld [vmem:[#allocation5 + $0x8] sm:$0xff]  ;;  %s116_s21 = sshll.u32 %s207_s0, 4  ;;  %s117_s21 = int_to_ptr.vmem [resolvable:$true] %s116_s21 }
  0x1e   :  { %vm76_vm0 = vcmp.eq.s32.totalorder %v72_v0, %v74_v2  ;;  %vm77_vm1 = vcmp.eq.s32.totalorder %v73_v1, %v75_v3  ;;  %s176_s22 = scalar_lea.vmem %s117_s21, 128  ;;  %p181_p11 = scmp.lt.s32.totalorder %s117_s21, %s117_s21 }
  0x1f   :  { %v78_v5 = vsel %vm76_vm0, 1, %v206_v4  ;;  %v79_v6 = vsel %vm77_vm1, 1, %v206_v4  ;;  %p177_p10 = scmp.ne.s32.totalorder %s117_s21, %s176_s22  ;;  %p182_p12 = scmp.lt.s32.totalorder %s176_s22, %s176_s22 }
  0x20   :  { %v81_v7 = vadd.s32 %v79_v6, %v78_v5 }
  0x21   :  { %p183_p13 = por %p182_p12, %p181_p11 }
  0x22   :  { %83 = vst [vmem:[#allocation7] sm:$0xff] %v81_v7 }
  0x23   :  { %p184_p0 = pnand %p183_p13, %p177_p10 }
  0x25   :  { %187 = shalt.err (!%p184_p0)
}
  0x26   :  { %119 = dma.vmem_to_hbm [thread:$0]  %s117_s21, 128, %s234_s2, [#allocation4]  }
  0x27   :  { %200 = dma.done.wait [#allocation4], 128  }
  0x28   :  { %201 = vsyncadd [#allocation4], 4294967168 }
  0x29   :  { %123 = vsyncpa [#allocation3], 1 }
  0x2a   :  { %124 = vsyncpa [#allocation6], 1 }
  0x2b   :  { %125 = vsyncpa [#allocation4], 1 }

</bundles_post_ra>
